<compile_context>
chip_gen: v7x
topology: tpu7x:2x2x1
jax: 0.10.0
libtpu: 0.0.40
codegen_flags: <defaults>
</compile_context>

<pallas_src>
import math

import jax
import jax.numpy as jnp
import numpy as np
from jax.experimental import pallas as pl
from jax.experimental.pallas import tpu as pltpu

# ---- tiny synthetic BERT config ----
VOCAB = 64
TYPE_VOCAB = 2
TYPE_PAD = 8            # type-embedding section padded to 8 rows (8-aligned slice)
SEQ = 8
HIDDEN = 32
NUM_HEADS = 4
HEAD_DIM = HIDDEN // NUM_HEADS
FFN = 64
LN_EPS = 1e-12
NEG_INF = -1e9


def _layer_norm(x, g, b):
    mu = jnp.mean(x, axis=-1, keepdims=True)
    var = jnp.mean(jnp.square(x - mu), axis=-1, keepdims=True)
    return (x - mu) * jax.lax.rsqrt(var + LN_EPS) * g + b


def _gelu(x):
    # TODO(synk): PyTorch nn.GELU default is exact erf-GELU; tanh approximation used here
    # (reference below uses the same variant, so the check is self-consistent).
    return 0.5 * x * (1.0 + jnp.tanh(0.7978845608028654 * (x + 0.044715 * x * x * x)))


def bert_kernel(ids_ref, tt_ref, attn_bias_ref,
                emb_ref, ln_ref, bvec_ref,
                wqkv_ref, wo_ref, w1_ref, w2_ref,
                out_ref):
    """Whole encoder forward on 2-D (B*S, H) activations, everything VMEM-resident."""
    f32 = jnp.float32
    BS = ids_ref.shape[0]
    H = HIDDEN

    # ---- embeddings: word + type gather fused into ONE one-hot 2-D matmul ----
    # The stacked table is [word (V rows) | type (8 rows, padded)], so a row of
    # the combined one-hot has a 1 at `ids` and a 1 at `V + token_type`; the
    # matmul therefore produces word_emb[ids] + type_emb[tt] in one MXU op.
    ids = ids_ref[...]                                             # (BS, 1) int32
    tt = tt_ref[...]                                               # (BS, 1) int32
    iota = jax.lax.broadcasted_iota(jnp.int32, (BS, VOCAB + TYPE_PAD), 1)
    oh = jnp.logical_or(iota == ids, iota == (tt + VOCAB)).astype(f32)
    emb = jnp.dot(oh, emb_ref[0:VOCAB + TYPE_PAD, :], preferred_element_type=f32)
    pos = emb_ref[VOCAB + TYPE_PAD:VOCAB + TYPE_PAD + BS, :]       # pre-tiled (BS, H)

    x = _layer_norm(emb + pos, ln_ref[0:1, :], ln_ref[1:2, :])     # (BS, H)

    # ---- fused QKV projection (attention scale pre-folded into the Q block) ----
    qkv = jnp.dot(x, wqkv_ref[...], preferred_element_type=f32) + bvec_ref[0:1, :]
    q = qkv[:, 0:H]
    k = qkv[:, H:2 * H]
    v = qkv[:, 2 * H:3 * H]

    attn_bias = attn_bias_ref[...]                                 # (BS, BS) additive

    # ---- multi-head self-attention over the flattened token axis ----
    # Cross-batch pairs are -1e9 in attn_bias, so flattening batch into the
    # sublane axis keeps per-batch semantics while every op stays a 2-D matmul.
    # Seed the accumulator with the attention-output bias (saves a trailing add).
    attn = jnp.broadcast_to(bvec_ref[1:2, 0:H], (BS, H))
    for h in range(NUM_HEADS):                                     # static unroll (4)
        lo = h * HEAD_DIM                                          # 8-aligned offsets
        hi = lo + HEAD_DIM
        qh = q[:, lo:hi]
        kh = k[:, lo:hi]
        vh = v[:, lo:hi]
        s = jax.lax.dot_general(qh, kh, (((1,), (1,)), ((), ())),
                                preferred_element_type=f32)        # (BS, BS) = q·kᵀ
        s = s + attn_bias
        s = s - jnp.max(s, axis=-1, keepdims=True)
        p = jnp.exp(s)
        r = pl.reciprocal(jnp.sum(p, axis=-1, keepdims=True), approx=True)
        ctx = jnp.dot(p, vh, preferred_element_type=f32) * r       # (BS, HD)
        # accumulate output projection per head -> no lane-axis concatenate
        attn = attn + jnp.dot(ctx, wo_ref[lo:hi, :], preferred_element_type=f32)

    x = _layer_norm(x + attn, ln_ref[2:3, :], ln_ref[3:4, :])

    # ---- feed-forward ----
    h1 = jnp.dot(x, w1_ref[...], preferred_element_type=f32) + bvec_ref[2:3, 0:FFN]
    h1 = _gelu(h1)
    h2 = jnp.dot(h1, w2_ref[...], preferred_element_type=f32) + bvec_ref[3:4, 0:H]
    out_ref[...] = _layer_norm(x + h2, ln_ref[4:5, :], ln_ref[5:6, :])


def init_params(key):
    ks = jax.random.split(key, 9)
    std = 0.02
    f32 = jnp.float32
    return {
        'word_emb': jax.random.normal(ks[0], (VOCAB, HIDDEN), f32) * std,
        'pos_emb':  jax.random.normal(ks[1], (SEQ, HIDDEN), f32) * std,
        'type_emb': jax.random.normal(ks[2], (TYPE_VOCAB, HIDDEN), f32) * std,
        'lne_g': jnp.ones((1, HIDDEN), f32), 'lne_b': jnp.zeros((1, HIDDEN), f32),
        'wq': jax.random.normal(ks[3], (HIDDEN, HIDDEN), f32) * std,
        'wk': jax.random.normal(ks[4], (HIDDEN, HIDDEN), f32) * std,
        'wv': jax.random.normal(ks[5], (HIDDEN, HIDDEN), f32) * std,
        'wo': jax.random.normal(ks[6], (HIDDEN, HIDDEN), f32) * std,
        'bq': jnp.zeros((1, HIDDEN), f32), 'bk': jnp.zeros((1, HIDDEN), f32),
        'bv': jnp.zeros((1, HIDDEN), f32), 'bo': jnp.zeros((1, HIDDEN), f32),
        'ln1_g': jnp.ones((1, HIDDEN), f32), 'ln1_b': jnp.zeros((1, HIDDEN), f32),
        'w1': jax.random.normal(ks[7], (HIDDEN, FFN), f32) * std,
        'b1': jnp.zeros((1, FFN), f32),
        'w2': jax.random.normal(ks[8], (FFN, HIDDEN), f32) * std,
        'b2': jnp.zeros((1, HIDDEN), f32),
        'ln2_g': jnp.ones((1, HIDDEN), f32), 'ln2_b': jnp.zeros((1, HIDDEN), f32),
    }


def _pack_params(params, B):
    """One-time operand packing: 22 tiny params -> 7 stacked arrays."""
    f32 = jnp.float32
    scale = 1.0 / math.sqrt(HEAD_DIM)
    # fused QKV with the softmax scale folded into the Q block (weight AND bias)
    wqkv = jnp.concatenate([params['wq'] * scale, params['wk'], params['wv']],
                           axis=1).astype(f32)                     # (H, 3H)
    bqkv = jnp.concatenate([params['bq'] * scale, params['bk'], params['bv']],
                           axis=1).astype(f32)                     # (1, 3H)

    def pad_w(vec):
        return jnp.pad(vec, ((0, 0), (0, 3 * HIDDEN - vec.shape[1])))

    bias_pack = jnp.concatenate(
        [bqkv, pad_w(params['bo']), pad_w(params['b1']), pad_w(params['b2'])],
        axis=0).astype(f32)                                        # (4, 3H)
    ln_pack = jnp.concatenate(
        [params['lne_g'], params['lne_b'],
         params['ln1_g'], params['ln1_b'],
         params['ln2_g'], params['ln2_b']], axis=0).astype(f32)    # (6, H)

    type_pad = jnp.pad(params['type_emb'],
                       ((0, TYPE_PAD - TYPE_VOCAB), (0, 0)))       # (8, H)
    pos_tiled = jnp.tile(params['pos_emb'], (B, 1))                # (B*S, H)
    emb_pack = jnp.concatenate([params['word_emb'], type_pad, pos_tiled],
                               axis=0).astype(f32)                 # (V+8+B*S, H)
    return (emb_pack, ln_pack, bias_pack, wqkv,
            params['wo'].astype(f32), params['w1'].astype(f32), params['w2'].astype(f32))


def wrapper_bert_forward(params, input_ids, atten, token_type):
    """WrapperBert.forward(input, atten, token_type) -> (B, S, H) sequence output."""
    B, S = input_ids.shape
    assert S == SEQ, f"positional table compiled for S={SEQ}, got {S}"
    BS = B * S

    ids_flat = input_ids.astype(jnp.int32).reshape(BS, 1)
    tt_flat = token_type.astype(jnp.int32).reshape(BS, 1)

    # Additive attention bias over the flattened token axis:
    # padding mask on keys + block mask forbidding cross-batch attention
    # (equivalent to BERT's extended_attention_mask preprocessing).
    tok = jnp.arange(BS, dtype=jnp.int32)
    same_batch = (tok[:, None] // S) == (tok[None, :] // S)
    key_ok = atten.astype(jnp.float32).reshape(1, BS) > 0.5
    attn_bias = jnp.where(same_batch & key_ok, 0.0, NEG_INF).astype(jnp.float32)

    emb_pack, ln_pack, bias_pack, wqkv, wo, w1, w2 = _pack_params(params, B)

    operands = [ids_flat, tt_flat, attn_bias,
                emb_pack, ln_pack, bias_pack,
                wqkv, wo, w1, w2]

    out2d = pl.pallas_call(
        bert_kernel,
        out_shape=jax.ShapeDtypeStruct((BS, HIDDEN), jnp.float32),
        in_specs=[pl.BlockSpec(memory_space=pltpu.MemorySpace.VMEM)
                  for _ in operands],
        out_specs=pl.BlockSpec(memory_space=pltpu.MemorySpace.VMEM),
    )(*operands)
    return out2d.reshape(B, S, HIDDEN)


def reference_forward(params, ids, atten, tt):
    """Pure-JAX reference of the same encoder (unpacked params)."""
    B, S = ids.shape
    x = params['word_emb'][ids] + params['type_emb'][tt] + params['pos_emb'][None]
    x = _layer_norm(x, params['lne_g'], params['lne_b'])
    q = (x @ params['wq'] + params['bq']).reshape(B, S, NUM_HEADS, HEAD_DIM)
    k = (x @ params['wk'] + params['bk']).reshape(B, S, NUM_HEADS, HEAD_DIM)
    v = (x @ params['wv'] + params['bv']).reshape(B, S, NUM_HEADS, HEAD_DIM)
    s = jnp.einsum('bqnd,bknd->bnqk', q, k) / math.sqrt(HEAD_DIM)
    s = s + ((1.0 - atten.astype(jnp.float32)) * NEG_INF)[:, None, None, :]
    p = jax.nn.softmax(s, axis=-1)
    ctx = jnp.einsum('bnqk,bknd->bqnd', p, v).reshape(B, S, HIDDEN)
    attn = ctx @ params['wo'] + params['bo']
    x = _layer_norm(x + attn, params['ln1_g'], params['ln1_b'])
    h = _gelu(x @ params['w1'] + params['b1'])
    h = h @ params['w2'] + params['b2']
    return _layer_norm(x + h, params['ln2_g'], params['ln2_b'])


if __name__ == "__main__":
    key = jax.random.PRNGKey(0)
    pkey, ikey, tkey = jax.random.split(key, 3)
    params = init_params(pkey)

    B = 2
    input_ids = jax.random.randint(ikey, (B, SEQ), 0, VOCAB, dtype=jnp.int32)
    token_type = jax.random.randint(tkey, (B, SEQ), 0, TYPE_VOCAB, dtype=jnp.int32)
    atten = jnp.ones((B, SEQ), jnp.int32).at[1, SEQ - 2:].set(0)   # pad last 2 of batch 1

    out = wrapper_bert_forward(params, input_ids, atten, token_type)
    jax.block_until_ready(out)

    ref = reference_forward(params, input_ids, atten, token_type)
    # tolerance loosened slightly for pl.reciprocal(approx=True) in the softmax
    np.testing.assert_allclose(np.asarray(out), np.asarray(ref), atol=2e-3, rtol=2e-3)
    print("KERNEL_OK")
</pallas_src>

<mosaic_0001>
module attributes {stable_mosaic.version = 11 : i64} {
  func.func @bert_kernel(%arg0: memref<16x1xi32, #tpu.memory_space<vmem>>, %arg1: memref<16x1xi32, #tpu.memory_space<vmem>>, %arg2: memref<16x16xf32, #tpu.memory_space<vmem>>, %arg3: memref<88x32xf32, #tpu.memory_space<vmem>>, %arg4: memref<6x32xf32, #tpu.memory_space<vmem>>, %arg5: memref<4x96xf32, #tpu.memory_space<vmem>>, %arg6: memref<32x96xf32, #tpu.memory_space<vmem>>, %arg7: memref<32x32xf32, #tpu.memory_space<vmem>>, %arg8: memref<32x64xf32, #tpu.memory_space<vmem>>, %arg9: memref<64x32xf32, #tpu.memory_space<vmem>>, %arg10: memref<16x32xf32, #tpu.memory_space<vmem>>) attributes {dimension_semantics = [], scalar_prefetch = 0 : i64, scratch_operands = 0 : i64, tpu.core_type = #tpu.core_type<tc>} {
    %c0 = arith.constant 0 : index
    %c0_0 = arith.constant 0 : index
    %0 = vector.load %arg0[%c0, %c0_0] : memref<16x1xi32, #tpu.memory_space<vmem>>, vector<16x1xi32>
    %c0_1 = arith.constant 0 : index
    %c0_2 = arith.constant 0 : index
    %1 = vector.load %arg1[%c0_1, %c0_2] : memref<16x1xi32, #tpu.memory_space<vmem>>, vector<16x1xi32>
    %2 = tpu.iota {dimensions = array<i32: 1>} : vector<16x72xi32>
    %3 = vector.broadcast %0 : vector<16x1xi32> to vector<16x72xi32>
    %4 = arith.cmpi eq, %2, %3 : vector<16x72xi32>
    %c64_i32 = arith.constant 64 : i32
    %5 = vector.broadcast %c64_i32 : i32 to vector<16x1xi32>
    %6 = arith.addi %1, %5 : vector<16x1xi32>
    %7 = vector.broadcast %6 : vector<16x1xi32> to vector<16x72xi32>
    %8 = arith.cmpi eq, %2, %7 : vector<16x72xi32>
    %9 = arith.ori %4, %8 : vector<16x72xi1>
    %10 = arith.extui %9 : vector<16x72xi1> to vector<16x72xi32>
    %11 = arith.sitofp %10 : vector<16x72xi32> to vector<16x72xf32>
    %c0_3 = arith.constant 0 : index
    %c0_4 = arith.constant 0 : index
    %12 = vector.load %arg3[%c0_3, %c0_4] : memref<88x32xf32, #tpu.memory_space<vmem>>, vector<72x32xf32>
    %cst = arith.constant dense<0.000000e+00> : vector<16x32xf32>
    %13 = tpu.matmul %11, %12, %cst {dimension_numbers = #tpu.dot_dimension_numbers<[1], [0], [0], [1], [0, 0, 1, 1], [], []>} : vector<16x72xf32>, vector<72x32xf32>, vector<16x32xf32> -> vector<16x32xf32>
    %c72 = arith.constant 72 : index
    %c0_5 = arith.constant 0 : index
    %14 = vector.load %arg3[%c72, %c0_5] : memref<88x32xf32, #tpu.memory_space<vmem>>, vector<16x32xf32>
    %15 = arith.addf %13, %14 : vector<16x32xf32>
    %c0_6 = arith.constant 0 : index
    %c0_7 = arith.constant 0 : index
    %16 = vector.load %arg4[%c0_6, %c0_7] : memref<6x32xf32, #tpu.memory_space<vmem>>, vector<1x32xf32>
    %c1 = arith.constant 1 : index
    %c0_8 = arith.constant 0 : index
    %17 = vector.load %arg4[%c1, %c0_8] : memref<6x32xf32, #tpu.memory_space<vmem>>, vector<1x32xf32>
    %cst_9 = arith.constant dense<0.000000e+00> : vector<16xf32>
    %18 = vector.multi_reduction <add>, %15, %cst_9 [1] : vector<16x32xf32> to vector<16xf32>
    %19 = vector.shape_cast %18 : vector<16xf32> to vector<16x1xf32>
    %cst_10 = arith.constant 3.200000e+01 : f32
    %20 = vector.broadcast %cst_10 : f32 to vector<16x1xf32>
    %21 = arith.divf %19, %20 : vector<16x1xf32>
    %22 = vector.broadcast %21 : vector<16x1xf32> to vector<16x32xf32>
    %23 = arith.subf %15, %22 : vector<16x32xf32>
    %24 = arith.mulf %23, %23 : vector<16x32xf32>
    %cst_11 = arith.constant dense<0.000000e+00> : vector<16xf32>
    %25 = vector.multi_reduction <add>, %24, %cst_11 [1] : vector<16x32xf32> to vector<16xf32>
    %26 = vector.shape_cast %25 : vector<16xf32> to vector<16x1xf32>
    %cst_12 = arith.constant 3.200000e+01 : f32
    %27 = vector.broadcast %cst_12 : f32 to vector<16x1xf32>
    %28 = arith.divf %26, %27 : vector<16x1xf32>
    %29 = vector.broadcast %21 : vector<16x1xf32> to vector<16x32xf32>
    %30 = arith.subf %15, %29 : vector<16x32xf32>
    %cst_13 = arith.constant 9.99999996E-13 : f32
    %31 = vector.broadcast %cst_13 : f32 to vector<16x1xf32>
    %32 = arith.addf %28, %31 : vector<16x1xf32>
    %33 = math.rsqrt %32 : vector<16x1xf32>
    %34 = vector.broadcast %33 : vector<16x1xf32> to vector<16x32xf32>
    %35 = arith.mulf %30, %34 : vector<16x32xf32>
    %36 = vector.broadcast %16 : vector<1x32xf32> to vector<16x32xf32>
    %37 = arith.mulf %35, %36 : vector<16x32xf32>
    %38 = vector.broadcast %17 : vector<1x32xf32> to vector<16x32xf32>
    %39 = arith.addf %37, %38 : vector<16x32xf32>
    %c0_14 = arith.constant 0 : index
    %c0_15 = arith.constant 0 : index
    %40 = vector.load %arg6[%c0_14, %c0_15] : memref<32x96xf32, #tpu.memory_space<vmem>>, vector<32x96xf32>
    %cst_16 = arith.constant dense<0.000000e+00> : vector<16x96xf32>
    %41 = tpu.matmul %39, %40, %cst_16 {dimension_numbers = #tpu.dot_dimension_numbers<[1], [0], [0], [1], [0, 0, 1, 1], [], []>} : vector<16x32xf32>, vector<32x96xf32>, vector<16x96xf32> -> vector<16x96xf32>
    %c0_17 = arith.constant 0 : index
    %c0_18 = arith.constant 0 : index
    %42 = vector.load %arg5[%c0_17, %c0_18] : memref<4x96xf32, #tpu.memory_space<vmem>>, vector<1x96xf32>
    %43 = vector.broadcast %42 : vector<1x96xf32> to vector<16x96xf32>
    %44 = arith.addf %41, %43 : vector<16x96xf32>
    %45 = vector.extract_strided_slice %44 {offsets = [0, 0], sizes = [16, 32], strides = [1, 1]} : vector<16x96xf32> to vector<16x32xf32>
    %46 = vector.extract_strided_slice %44 {offsets = [0, 32], sizes = [16, 32], strides = [1, 1]} : vector<16x96xf32> to vector<16x32xf32>
    %47 = vector.extract_strided_slice %44 {offsets = [0, 64], sizes = [16, 32], strides = [1, 1]} : vector<16x96xf32> to vector<16x32xf32>
    %c0_19 = arith.constant 0 : index
    %c0_20 = arith.constant 0 : index
    %48 = vector.load %arg2[%c0_19, %c0_20] : memref<16x16xf32, #tpu.memory_space<vmem>>, vector<16x16xf32>
    %c1_21 = arith.constant 1 : index
    %c0_22 = arith.constant 0 : index
    %49 = vector.load %arg5[%c1_21, %c0_22] : memref<4x96xf32, #tpu.memory_space<vmem>>, vector<1x32xf32>
    %50 = vector.shape_cast %49 : vector<1x32xf32> to vector<1x32xf32>
    %51 = vector.broadcast %50 : vector<1x32xf32> to vector<16x32xf32>
    %52 = vector.extract_strided_slice %45 {offsets = [0, 0], sizes = [16, 8], strides = [1, 1]} : vector<16x32xf32> to vector<16x8xf32>
    %53 = vector.extract_strided_slice %46 {offsets = [0, 0], sizes = [16, 8], strides = [1, 1]} : vector<16x32xf32> to vector<16x8xf32>
    %54 = vector.extract_strided_slice %47 {offsets = [0, 0], sizes = [16, 8], strides = [1, 1]} : vector<16x32xf32> to vector<16x8xf32>
    %cst_23 = arith.constant dense<0.000000e+00> : vector<16x16xf32>
    %55 = tpu.matmul %52, %53, %cst_23 {dimension_numbers = #tpu.dot_dimension_numbers<[1], [1], [0], [0], [0, 0, 1, 0], [], []>} : vector<16x8xf32>, vector<16x8xf32>, vector<16x16xf32> -> vector<16x16xf32>
    %56 = arith.addf %55, %48 : vector<16x16xf32>
    %cst_24 = arith.constant dense<0xFF800000> : vector<16xf32>
    %57 = vector.multi_reduction <maximumf>, %56, %cst_24 [1] : vector<16x16xf32> to vector<16xf32>
    %58 = vector.shape_cast %57 : vector<16xf32> to vector<16x1xf32>
    %59 = vector.broadcast %58 : vector<16x1xf32> to vector<16x16xf32>
    %60 = arith.subf %56, %59 : vector<16x16xf32>
    %61 = math.exp %60 : vector<16x16xf32>
    %cst_25 = arith.constant dense<0.000000e+00> : vector<16xf32>
    %62 = vector.multi_reduction <add>, %61, %cst_25 [1] : vector<16x16xf32> to vector<16xf32>
    %63 = vector.shape_cast %62 : vector<16xf32> to vector<16x1xf32>
    %64 = tpu.reciprocal %63 {approx = true} : vector<16x1xf32> -> vector<16x1xf32>
    %cst_26 = arith.constant dense<0.000000e+00> : vector<16x8xf32>
    %65 = tpu.matmul %61, %54, %cst_26 {dimension_numbers = #tpu.dot_dimension_numbers<[1], [0], [0], [1], [0, 0, 1, 1], [], []>} : vector<16x16xf32>, vector<16x8xf32>, vector<16x8xf32> -> vector<16x8xf32>
    %66 = vector.broadcast %64 : vector<16x1xf32> to vector<16x8xf32>
    %67 = arith.mulf %65, %66 : vector<16x8xf32>
    %c0_27 = arith.constant 0 : index
    %c0_28 = arith.constant 0 : index
    %68 = vector.load %arg7[%c0_27, %c0_28] : memref<32x32xf32, #tpu.memory_space<vmem>>, vector<8x32xf32>
    %cst_29 = arith.constant dense<0.000000e+00> : vector<16x32xf32>
    %69 = tpu.matmul %67, %68, %cst_29 {dimension_numbers = #tpu.dot_dimension_numbers<[1], [0], [0], [1], [0, 0, 1, 1], [], []>} : vector<16x8xf32>, vector<8x32xf32>, vector<16x32xf32> -> vector<16x32xf32>
    %70 = arith.addf %51, %69 : vector<16x32xf32>
    %71 = vector.extract_strided_slice %45 {offsets = [0, 8], sizes = [16, 8], strides = [1, 1]} : vector<16x32xf32> to vector<16x8xf32>
    %72 = vector.extract_strided_slice %46 {offsets = [0, 8], sizes = [16, 8], strides = [1, 1]} : vector<16x32xf32> to vector<16x8xf32>
    %73 = vector.extract_strided_slice %47 {offsets = [0, 8], sizes = [16, 8], strides = [1, 1]} : vector<16x32xf32> to vector<16x8xf32>
    %cst_30 = arith.constant dense<0.000000e+00> : vector<16x16xf32>
    %74 = tpu.matmul %71, %72, %cst_30 {dimension_numbers = #tpu.dot_dimension_numbers<[1], [1], [0], [0], [0, 0, 1, 0], [], []>} : vector<16x8xf32>, vector<16x8xf32>, vector<16x16xf32> -> vector<16x16xf32>
    %75 = arith.addf %74, %48 : vector<16x16xf32>
    %cst_31 = arith.constant dense<0xFF800000> : vector<16xf32>
    %76 = vector.multi_reduction <maximumf>, %75, %cst_31 [1] : vector<16x16xf32> to vector<16xf32>
    %77 = vector.shape_cast %76 : vector<16xf32> to vector<16x1xf32>
    %78 = vector.broadcast %77 : vector<16x1xf32> to vector<16x16xf32>
    %79 = arith.subf %75, %78 : vector<16x16xf32>
    %80 = math.exp %79 : vector<16x16xf32>
    %cst_32 = arith.constant dense<0.000000e+00> : vector<16xf32>
    %81 = vector.multi_reduction <add>, %80, %cst_32 [1] : vector<16x16xf32> to vector<16xf32>
    %82 = vector.shape_cast %81 : vector<16xf32> to vector<16x1xf32>
    %83 = tpu.reciprocal %82 {approx = true} : vector<16x1xf32> -> vector<16x1xf32>
    %cst_33 = arith.constant dense<0.000000e+00> : vector<16x8xf32>
    %84 = tpu.matmul %80, %73, %cst_33 {dimension_numbers = #tpu.dot_dimension_numbers<[1], [0], [0], [1], [0, 0, 1, 1], [], []>} : vector<16x16xf32>, vector<16x8xf32>, vector<16x8xf32> -> vector<16x8xf32>
    %85 = vector.broadcast %83 : vector<16x1xf32> to vector<16x8xf32>
    %86 = arith.mulf %84, %85 : vector<16x8xf32>
    %c8 = arith.constant 8 : index
    %c0_34 = arith.constant 0 : index
    %87 = vector.load %arg7[%c8, %c0_34] : memref<32x32xf32, #tpu.memory_space<vmem>>, vector<8x32xf32>
    %cst_35 = arith.constant dense<0.000000e+00> : vector<16x32xf32>
    %88 = tpu.matmul %86, %87, %cst_35 {dimension_numbers = #tpu.dot_dimension_numbers<[1], [0], [0], [1], [0, 0, 1, 1], [], []>} : vector<16x8xf32>, vector<8x32xf32>, vector<16x32xf32> -> vector<16x32xf32>
    %89 = arith.addf %70, %88 : vector<16x32xf32>
    %90 = vector.extract_strided_slice %45 {offsets = [0, 16], sizes = [16, 8], strides = [1, 1]} : vector<16x32xf32> to vector<16x8xf32>
    %91 = vector.extract_strided_slice %46 {offsets = [0, 16], sizes = [16, 8], strides = [1, 1]} : vector<16x32xf32> to vector<16x8xf32>
    %92 = vector.extract_strided_slice %47 {offsets = [0, 16], sizes = [16, 8], strides = [1, 1]} : vector<16x32xf32> to vector<16x8xf32>
    %cst_36 = arith.constant dense<0.000000e+00> : vector<16x16xf32>
    %93 = tpu.matmul %90, %91, %cst_36 {dimension_numbers = #tpu.dot_dimension_numbers<[1], [1], [0], [0], [0, 0, 1, 0], [], []>} : vector<16x8xf32>, vector<16x8xf32>, vector<16x16xf32> -> vector<16x16xf32>
    %94 = arith.addf %93, %48 : vector<16x16xf32>
    %cst_37 = arith.constant dense<0xFF800000> : vector<16xf32>
    %95 = vector.multi_reduction <maximumf>, %94, %cst_37 [1] : vector<16x16xf32> to vector<16xf32>
    %96 = vector.shape_cast %95 : vector<16xf32> to vector<16x1xf32>
    %97 = vector.broadcast %96 : vector<16x1xf32> to vector<16x16xf32>
    %98 = arith.subf %94, %97 : vector<16x16xf32>
    %99 = math.exp %98 : vector<16x16xf32>
    %cst_38 = arith.constant dense<0.000000e+00> : vector<16xf32>
    %100 = vector.multi_reduction <add>, %99, %cst_38 [1] : vector<16x16xf32> to vector<16xf32>
    %101 = vector.shape_cast %100 : vector<16xf32> to vector<16x1xf32>
    %102 = tpu.reciprocal %101 {approx = true} : vector<16x1xf32> -> vector<16x1xf32>
    %cst_39 = arith.constant dense<0.000000e+00> : vector<16x8xf32>
    %103 = tpu.matmul %99, %92, %cst_39 {dimension_numbers = #tpu.dot_dimension_numbers<[1], [0], [0], [1], [0, 0, 1, 1], [], []>} : vector<16x16xf32>, vector<16x8xf32>, vector<16x8xf32> -> vector<16x8xf32>
    %104 = vector.broadcast %102 : vector<16x1xf32> to vector<16x8xf32>
    %105 = arith.mulf %103, %104 : vector<16x8xf32>
    %c16 = arith.constant 16 : index
    %c0_40 = arith.constant 0 : index
    %106 = vector.load %arg7[%c16, %c0_40] : memref<32x32xf32, #tpu.memory_space<vmem>>, vector<8x32xf32>
    %cst_41 = arith.constant dense<0.000000e+00> : vector<16x32xf32>
    %107 = tpu.matmul %105, %106, %cst_41 {dimension_numbers = #tpu.dot_dimension_numbers<[1], [0], [0], [1], [0, 0, 1, 1], [], []>} : vector<16x8xf32>, vector<8x32xf32>, vector<16x32xf32> -> vector<16x32xf32>
    %108 = arith.addf %89, %107 : vector<16x32xf32>
    %109 = vector.extract_strided_slice %45 {offsets = [0, 24], sizes = [16, 8], strides = [1, 1]} : vector<16x32xf32> to vector<16x8xf32>
    %110 = vector.extract_strided_slice %46 {offsets = [0, 24], sizes = [16, 8], strides = [1, 1]} : vector<16x32xf32> to vector<16x8xf32>
    %111 = vector.extract_strided_slice %47 {offsets = [0, 24], sizes = [16, 8], strides = [1, 1]} : vector<16x32xf32> to vector<16x8xf32>
    %cst_42 = arith.constant dense<0.000000e+00> : vector<16x16xf32>
    %112 = tpu.matmul %109, %110, %cst_42 {dimension_numbers = #tpu.dot_dimension_numbers<[1], [1], [0], [0], [0, 0, 1, 0], [], []>} : vector<16x8xf32>, vector<16x8xf32>, vector<16x16xf32> -> vector<16x16xf32>
    %113 = arith.addf %112, %48 : vector<16x16xf32>
    %cst_43 = arith.constant dense<0xFF800000> : vector<16xf32>
    %114 = vector.multi_reduction <maximumf>, %113, %cst_43 [1] : vector<16x16xf32> to vector<16xf32>
    %115 = vector.shape_cast %114 : vector<16xf32> to vector<16x1xf32>
    %116 = vector.broadcast %115 : vector<16x1xf32> to vector<16x16xf32>
    %117 = arith.subf %113, %116 : vector<16x16xf32>
    %118 = math.exp %117 : vector<16x16xf32>
    %cst_44 = arith.constant dense<0.000000e+00> : vector<16xf32>
    %119 = vector.multi_reduction <add>, %118, %cst_44 [1] : vector<16x16xf32> to vector<16xf32>
    %120 = vector.shape_cast %119 : vector<16xf32> to vector<16x1xf32>
    %121 = tpu.reciprocal %120 {approx = true} : vector<16x1xf32> -> vector<16x1xf32>
    %cst_45 = arith.constant dense<0.000000e+00> : vector<16x8xf32>
    %122 = tpu.matmul %118, %111, %cst_45 {dimension_numbers = #tpu.dot_dimension_numbers<[1], [0], [0], [1], [0, 0, 1, 1], [], []>} : vector<16x16xf32>, vector<16x8xf32>, vector<16x8xf32> -> vector<16x8xf32>
    %123 = vector.broadcast %121 : vector<16x1xf32> to vector<16x8xf32>
    %124 = arith.mulf %122, %123 : vector<16x8xf32>
    %c24 = arith.constant 24 : index
    %c0_46 = arith.constant 0 : index
    %125 = vector.load %arg7[%c24, %c0_46] : memref<32x32xf32, #tpu.memory_space<vmem>>, vector<8x32xf32>
    %cst_47 = arith.constant dense<0.000000e+00> : vector<16x32xf32>
    %126 = tpu.matmul %124, %125, %cst_47 {dimension_numbers = #tpu.dot_dimension_numbers<[1], [0], [0], [1], [0, 0, 1, 1], [], []>} : vector<16x8xf32>, vector<8x32xf32>, vector<16x32xf32> -> vector<16x32xf32>
    %127 = arith.addf %108, %126 : vector<16x32xf32>
    %128 = arith.addf %39, %127 : vector<16x32xf32>
    %c2 = arith.constant 2 : index
    %c0_48 = arith.constant 0 : index
    %129 = vector.load %arg4[%c2, %c0_48] : memref<6x32xf32, #tpu.memory_space<vmem>>, vector<1x32xf32>
    %c3 = arith.constant 3 : index
    %c0_49 = arith.constant 0 : index
    %130 = vector.load %arg4[%c3, %c0_49] : memref<6x32xf32, #tpu.memory_space<vmem>>, vector<1x32xf32>
    %cst_50 = arith.constant dense<0.000000e+00> : vector<16xf32>
    %131 = vector.multi_reduction <add>, %128, %cst_50 [1] : vector<16x32xf32> to vector<16xf32>
    %132 = vector.shape_cast %131 : vector<16xf32> to vector<16x1xf32>
    %cst_51 = arith.constant 3.200000e+01 : f32
    %133 = vector.broadcast %cst_51 : f32 to vector<16x1xf32>
    %134 = arith.divf %132, %133 : vector<16x1xf32>
    %135 = vector.broadcast %134 : vector<16x1xf32> to vector<16x32xf32>
    %136 = arith.subf %128, %135 : vector<16x32xf32>
    %137 = arith.mulf %136, %136 : vector<16x32xf32>
    %cst_52 = arith.constant dense<0.000000e+00> : vector<16xf32>
    %138 = vector.multi_reduction <add>, %137, %cst_52 [1] : vector<16x32xf32> to vector<16xf32>
    %139 = vector.shape_cast %138 : vector<16xf32> to vector<16x1xf32>
    %cst_53 = arith.constant 3.200000e+01 : f32
    %140 = vector.broadcast %cst_53 : f32 to vector<16x1xf32>
    %141 = arith.divf %139, %140 : vector<16x1xf32>
    %142 = vector.broadcast %134 : vector<16x1xf32> to vector<16x32xf32>
    %143 = arith.subf %128, %142 : vector<16x32xf32>
    %cst_54 = arith.constant 9.99999996E-13 : f32
    %144 = vector.broadcast %cst_54 : f32 to vector<16x1xf32>
    %145 = arith.addf %141, %144 : vector<16x1xf32>
    %146 = math.rsqrt %145 : vector<16x1xf32>
    %147 = vector.broadcast %146 : vector<16x1xf32> to vector<16x32xf32>
    %148 = arith.mulf %143, %147 : vector<16x32xf32>
    %149 = vector.broadcast %129 : vector<1x32xf32> to vector<16x32xf32>
    %150 = arith.mulf %148, %149 : vector<16x32xf32>
    %151 = vector.broadcast %130 : vector<1x32xf32> to vector<16x32xf32>
    %152 = arith.addf %150, %151 : vector<16x32xf32>
    %c0_55 = arith.constant 0 : index
    %c0_56 = arith.constant 0 : index
    %153 = vector.load %arg8[%c0_55, %c0_56] : memref<32x64xf32, #tpu.memory_space<vmem>>, vector<32x64xf32>
    %cst_57 = arith.constant dense<0.000000e+00> : vector<16x64xf32>
    %154 = tpu.matmul %152, %153, %cst_57 {dimension_numbers = #tpu.dot_dimension_numbers<[1], [0], [0], [1], [0, 0, 1, 1], [], []>} : vector<16x32xf32>, vector<32x64xf32>, vector<16x64xf32> -> vector<16x64xf32>
    %c2_58 = arith.constant 2 : index
    %c0_59 = arith.constant 0 : index
    %155 = vector.load %arg5[%c2_58, %c0_59] : memref<4x96xf32, #tpu.memory_space<vmem>>, vector<1x64xf32>
    %156 = vector.broadcast %155 : vector<1x64xf32> to vector<16x64xf32>
    %157 = arith.addf %154, %156 : vector<16x64xf32>
    %cst_60 = arith.constant 5.000000e-01 : f32
    %158 = vector.broadcast %cst_60 : f32 to vector<16x64xf32>
    %159 = arith.mulf %158, %157 : vector<16x64xf32>
    %cst_61 = arith.constant 4.471500e-02 : f32
    %160 = vector.broadcast %cst_61 : f32 to vector<16x64xf32>
    %161 = arith.mulf %160, %157 : vector<16x64xf32>
    %162 = arith.mulf %161, %157 : vector<16x64xf32>
    %163 = arith.mulf %162, %157 : vector<16x64xf32>
    %164 = arith.addf %157, %163 : vector<16x64xf32>
    %cst_62 = arith.constant 0.797884583 : f32
    %165 = vector.broadcast %cst_62 : f32 to vector<16x64xf32>
    %166 = arith.mulf %165, %164 : vector<16x64xf32>
    %167 = math.tanh %166 : vector<16x64xf32>
    %cst_63 = arith.constant 1.000000e+00 : f32
    %168 = vector.broadcast %cst_63 : f32 to vector<16x64xf32>
    %169 = arith.addf %168, %167 : vector<16x64xf32>
    %170 = arith.mulf %159, %169 : vector<16x64xf32>
    %c0_64 = arith.constant 0 : index
    %c0_65 = arith.constant 0 : index
    %171 = vector.load %arg9[%c0_64, %c0_65] : memref<64x32xf32, #tpu.memory_space<vmem>>, vector<64x32xf32>
    %cst_66 = arith.constant dense<0.000000e+00> : vector<16x32xf32>
    %172 = tpu.matmul %170, %171, %cst_66 {dimension_numbers = #tpu.dot_dimension_numbers<[1], [0], [0], [1], [0, 0, 1, 1], [], []>} : vector<16x64xf32>, vector<64x32xf32>, vector<16x32xf32> -> vector<16x32xf32>
    %c3_67 = arith.constant 3 : index
    %c0_68 = arith.constant 0 : index
    %173 = vector.load %arg5[%c3_67, %c0_68] : memref<4x96xf32, #tpu.memory_space<vmem>>, vector<1x32xf32>
    %174 = vector.broadcast %173 : vector<1x32xf32> to vector<16x32xf32>
    %175 = arith.addf %172, %174 : vector<16x32xf32>
    %176 = arith.addf %152, %175 : vector<16x32xf32>
    %c4 = arith.constant 4 : index
    %c0_69 = arith.constant 0 : index
    %177 = vector.load %arg4[%c4, %c0_69] : memref<6x32xf32, #tpu.memory_space<vmem>>, vector<1x32xf32>
    %c5 = arith.constant 5 : index
    %c0_70 = arith.constant 0 : index
    %178 = vector.load %arg4[%c5, %c0_70] : memref<6x32xf32, #tpu.memory_space<vmem>>, vector<1x32xf32>
    %cst_71 = arith.constant dense<0.000000e+00> : vector<16xf32>
    %179 = vector.multi_reduction <add>, %176, %cst_71 [1] : vector<16x32xf32> to vector<16xf32>
    %180 = vector.shape_cast %179 : vector<16xf32> to vector<16x1xf32>
    %cst_72 = arith.constant 3.200000e+01 : f32
    %181 = vector.broadcast %cst_72 : f32 to vector<16x1xf32>
    %182 = arith.divf %180, %181 : vector<16x1xf32>
    %183 = vector.broadcast %182 : vector<16x1xf32> to vector<16x32xf32>
    %184 = arith.subf %176, %183 : vector<16x32xf32>
    %185 = arith.mulf %184, %184 : vector<16x32xf32>
    %cst_73 = arith.constant dense<0.000000e+00> : vector<16xf32>
    %186 = vector.multi_reduction <add>, %185, %cst_73 [1] : vector<16x32xf32> to vector<16xf32>
    %187 = vector.shape_cast %186 : vector<16xf32> to vector<16x1xf32>
    %cst_74 = arith.constant 3.200000e+01 : f32
    %188 = vector.broadcast %cst_74 : f32 to vector<16x1xf32>
    %189 = arith.divf %187, %188 : vector<16x1xf32>
    %190 = vector.broadcast %182 : vector<16x1xf32> to vector<16x32xf32>
    %191 = arith.subf %176, %190 : vector<16x32xf32>
    %cst_75 = arith.constant 9.99999996E-13 : f32
    %192 = vector.broadcast %cst_75 : f32 to vector<16x1xf32>
    %193 = arith.addf %189, %192 : vector<16x1xf32>
    %194 = math.rsqrt %193 : vector<16x1xf32>
    %195 = vector.broadcast %194 : vector<16x1xf32> to vector<16x32xf32>
    %196 = arith.mulf %191, %195 : vector<16x32xf32>
    %197 = vector.broadcast %177 : vector<1x32xf32> to vector<16x32xf32>
    %198 = arith.mulf %196, %197 : vector<16x32xf32>
    %199 = vector.broadcast %178 : vector<1x32xf32> to vector<16x32xf32>
    %200 = arith.addf %198, %199 : vector<16x32xf32>
    %c0_76 = arith.constant 0 : index
    %c0_77 = arith.constant 0 : index
    %201 = vector.load %arg10[%c0_76, %c0_77] : memref<16x32xf32, #tpu.memory_space<vmem>>, vector<16x32xf32>
    tpu.vector_store %arg10[%c0_76, %c0_77], %200 {strides = array<i32>} : memref<16x32xf32, #tpu.memory_space<vmem>>, vector<16x32xf32>,
    return
  }
}

</mosaic_0001>

<bundles_post_ra>
// kernel: tpu_custom_call.1
= control target key start
LH: loop header
LB: loop body
LE: loop exit
PB: predicated region body
PF: predicated region fallthrough
CT: control target
= control target key end

     0   :  { %v2232_v3 = vmov 0   ;;  %s2586_s0 = inlined_call_operand.vmem [shape: s32[16,1], index: 0, kind: input, shape index: {}]   ;;  %s2587_s1 = inlined_call_operand.vmem [shape: s32[16,1], index: 1, kind: input, shape index: {}]   ;;  %s2588_s2 = inlined_call_operand.vmem [shape: f32[16,16], index: 2, kind: input, shape index: {}]   ;;  %s2589_s3 = inlined_call_operand.vmem [shape: f32[88,32], index: 3, kind: input, shape index: {}]   ;;  %s2590_s4 = inlined_call_operand.vmem [shape: f32[6,32], index: 4, kind: input, shape index: {}]   ;;  %s2591_s5 = inlined_call_operand.vmem [shape: f32[4,96], index: 5, kind: input, shape index: {}]   ;;  %s2592_s6 = inlined_call_operand.vmem [shape: f32[32,96], index: 6, kind: input, shape index: {}]   ;;  %s2593_s7 = inlined_call_operand.vmem [shape: f32[32,32], index: 7, kind: input, shape index: {}]   ;;  %s2594_s8 = inlined_call_operand.vmem [shape: f32[32,64], index: 8, kind: input, shape index: {}]   ;;  %s2595_s9 = inlined_call_operand.vmem [shape: f32[64,32], index: 9, kind: input, shape index: {}]   ;;  %s2596_s10 = inlined_call_operand.hbm [shape: f32[16,32], index: 10, kind: output, shape index: {}]  }
   0x1   :  { %v37_v0 = vld [vmem:[%s2586_s0 + $0x8] sm:$0xff]  ;;  %v36_v1 = vld [vmem:[%s2586_s0] sm:$0xff]  ;;  %2119 = vset.pattern.permute.xlu1 %v2232_v3  ;;  %2118 = vset.pattern.permute.xlu0 %v2232_v3  ;;  %v68_v10 = vld [vmem:[%s2589_s3 + $0x10] sm:$0xff] }
   0x2   :  { %v39_v2 = vld [vmem:[%s2587_s1 + $0x8] sm:$0xff]  ;;  %v38_v4 = vld [vmem:[%s2587_s1] sm:$0xff]  ;;  %46 = vperm.xlu1 %2119, %v37_v0   ;;  %43 = vperm.xlu0 %2118, %v36_v1   ;;  %v69_v11 = vld [vmem:[%s2589_s3 + $0x18] sm:$0xff] }
   0x3   :  { %v66_v5 = vld [vmem:[%s2589_s3] sm:$0xff]  ;;  %v67_v6 = vld [vmem:[%s2589_s3 + $0x8] sm:$0xff]  ;;  %v51_v7 = vadd.s32 64, %v39_v2  ;;  %v50_v8 = vadd.s32 64, %v38_v4  ;;  %v2010_v12 = vpack.c.bf16 %v69_v11, %v68_v10 }
   0x4   :  { %v2006_v9 = vpack.c.bf16 %v67_v6, %v66_v5  ;;  %v70_v13 = vld [vmem:[%s2589_s3 + $0x20] sm:$0xff]  ;;  %v71_v14 = vld [vmem:[%s2589_s3 + $0x28] sm:$0xff] }
   0x6   :  { %2007 = vmatprep.subr.bf16.mxu0 %v2006_v9 }
   0x7   :  { %15 = vsyncpa [#allocation3], 0  ;;  %2009 = vmatpush3.bf16.msra.mxu0 %v2006_v9  ;;  %56 = vperm.xlu1 %2119, %v51_v7   ;;  %v2014_v15 = vpack.c.bf16 %v71_v14, %v70_v13  ;;  %v72_v16 = vld [vmem:[%s2589_s3 + $0x30] sm:$0xff]  ;;  %v73_v17 = vld [vmem:[%s2589_s3 + $0x38] sm:$0xff]  ;;  %v40_v20 = vlaneseq  ;;  %vm77_vm5 = vcmask 588800   ;;  %v2233_v26 = vmov 0.0  }
   0x8   :  { %53 = vperm.xlu0 %2118, %v50_v8   ;;  %2011 = vmatprep.subr.bf16.mxu0 %v2010_v12  ;;  %v2018_v18 = vpack.c.bf16 %v73_v17, %v72_v16  ;;  %v74_v19 = vld [vmem:[%s2589_s3 + $0x40] sm:$0xff]  ;;  %v76_v29 = vld [vmem:[%s2589_s3 + $0x50] sm:$0xff]  ;;  %v75_v30 = vld [vmem:[%s2589_s3 + $0x48] sm:$0xff]  ;;  %vm161_vm7 = vcmask 261120   ;;  %vm304_vm8 = vcmask 64512   ;;  %s2234_s11 = smov 96  }
   0x9   :  { %v41_v23 = vand.u32 127, %v40_v20  ;;  %v201_v47 = vld [vmem:[%s2592_s6] sm:$0xff]  ;;  %v202_v48 = vld [vmem:[%s2592_s6 + $0x8] sm:$0xff]  ;;  %v203_v49 = vld [vmem:[%s2592_s6 + $0x10] sm:$0xff]  ;;  %s2235_s12 = smov 88   ;;  %vm388_vm10 = vcmask 130048  }
   0xa   :  { %v2022_v50 = vpack.c.bf16 %v202_v48, %v201_v47  ;;  %v204_v51 = vld [vmem:[%s2592_s6 + $0x18] sm:$0xff]  ;;  %v1743_v60 = vld [vmem:[%s2590_s4] ss:$0 sm:$0xff]  ;;  %v1744_v62 = vld [vmem:[%s2590_s4 + $0x1] ss:$0 sm:$0xff]  ;;  %s2236_s17 = smov 64  }
   0xb   :  { %2013 = vmatpush3.bf16.msra.mxu0 %v2010_v12  ;;  %v2026_v52 = vpack.c.bf16 %v204_v51, %v203_v49  ;;  %v1745_v5 = vld [vmem:[%s2591_s5] ss:$0 sm:$0xff]  ;;  %vm2395_vm9 = vmpackc.low %vm304_vm8, %vm304_vm8  ;;  %v2408_v16 = vld [vmem:[%s2588_s2 + $0x8] sm:$0xff]  ;;  %s2237_s19 = smov 120   ;;  %s2238_s20 = smov 80   ;;  %vm1597_vm11 = vcmask 523264  }
   0xc   :  { %2015 = vmatprep.subr.bf16.mxu0 %v2014_v15  ;;  %2023 = vmatprep.subr.bf16.mxu1 %v2022_v50  ;;  %s2239_s3 = smov 112   ;;  %s2240_s21 = smov 72  }
   0xd   :  { %2025 = vmatpush3.bf16.msra.mxu1 %v2022_v50  ;;  %s2241_s22 = smov 104   ;;  %s2242_s23 = smov 56  }
   0xe   :  { %2027 = vmatprep.subr.bf16.mxu1 %v2026_v52  ;;  %s2243_s24 = smov 48   ;;  %s2244_s26 = smov 40  }
   0xf   :  { %2017 = vmatpush3.bf16.msra.mxu0 %v2014_v15 }
  0x10   :  { %2019 = vmatprep.subr.bf16.mxu0 %v2018_v18 }
  0x11   :  { %2029 = vmatpush3.bf16.msra.mxu1 %v2026_v52 }
  0x13   :  { %2021 = vmatpush3.bf16.msra.mxu0 %v2018_v18  ;;  %v2413_v18 = vld [vmem:[%s2588_s2] sm:$0xff] }
  0x14   :  { %1884 = vmatprep.subr.mxu0 %v74_v19 }
  0x17   :  { %1885 = vmatpush3.msra.mxu0 %v74_v19 }
  0x81   :  { %v47_v21 = vpop.permute.xlu1 %46  ;;  %v44_v22 = vpop.permute.xlu0 %43 }
  0x82   :  { %vm49_vm0 = vcmp.eq.s32.totalorder %v41_v23, %v47_v21  ;;  %vm48_vm3 = vcmp.eq.s32.totalorder %v41_v23, %v44_v22 }
  0x86   :  { %v57_v24 = vpop.permute.xlu1 %56 }
  0x87   :  { %v54_v25 = vpop.permute.xlu0 %53  ;;  %vm59_vm1 = vcmp.eq.s32.totalorder %v41_v23, %v57_v24 }
  0x88   :  { %vm58_vm2 = vcmp.eq.s32.totalorder %v41_v23, %v54_v25  ;;  %vm61_vm4 = vmor %vm49_vm0, %vm59_vm1 }
  0x89   :  { %vm60_vm6 = vmor %vm48_vm3, %vm58_vm2  ;;  %v1740_v27 = vsel %vm61_vm4, 1.0, %v2233_v26 }
  0x8a   :  { %v1739_v28 = vsel %vm60_vm6, 1.0, %v2233_v26 }
  0x8b   :  { %1886 = vmatprep.mubr.msk.f32.mxu0 %vm77_vm5, %v1739_v28 }
  0x8c   :  { %1887 = vmatmul.mubr.msk.f32.vlgmr.msra.gmra.mrb[0].mxu0 %vm77_vm5, %v1740_v27 }
 0x15f   :  { %v1888_v31 = vpop.f32.mrb[0].mxu0 }
 0x160   :  { %v156_v32 = vadd.f32 %v1888_v31, %v76_v29  ;;  %v150_v33 = vpop.f32.mrb[1].mxu0 }
 0x161   :  { %v151_v34 = vadd.f32 %v150_v33, %v75_v30 }
 0x162   :  { %v165_v35 = vsel %vm161_vm7, %v156_v32, 0.0 }
 0x163   :  { %166 = vadd.xlane.f32.xlu1 %v165_v35  ;;  %v162_v36 = vsel %vm161_vm7, %v151_v34, 0.0 }
 0x164   :  { %163 = vadd.xlane.f32.xlu0 %v162_v36 }
 0x1f0   :  { %v167_v37 = vpop.xlane.xlu1 %166 }
 0x1f1   :  { %v170_v38 = vmul.f32 0.03125, %v167_v37  ;;  %v164_v39 = vpop.xlane.xlu0 %163 }
 0x1f2   :  { %v169_v40 = vmul.f32 0.03125, %v164_v39 }
 0x1f3   :  { %v172_v41 = vsub.f32 %v156_v32, %v170_v38 }
 0x1f4   :  { %v171_v42 = vsub.f32 %v151_v34, %v169_v40  ;;  %v498_v34 = vld [vmem:[%s2593_s7] sm:$0xff] }
 0x1f5   :  { %v174_v45 = vmul.f32 %v172_v41, %v172_v41 }
 0x1f6   :  { %v173_v43 = vmul.f32 %v171_v42, %v171_v42 }
 0x1f7   :  { %v178_v46 = vsel %vm161_vm7, %v174_v45, 0.0 }
 0x1f8   :  { %v175_v44 = vsel %vm161_vm7, %v173_v43, 0.0 }
 0x1f9   :  { %176 = vadd.xlane.f32.xlu0 %v175_v44 }
 0x1fd   :  { %179 = vadd.xlane.f32.xlu0 %v178_v46 }
 0x286   :  { %v177_v53 = vpop.xlane.xlu0 %176 }
 0x287   :  { %v181_v54 = vmul.f32 0.03125, %v177_v53 }
 0x289   :  { %v183_v55 = vadd.f32 1e-12, %v181_v54 }
 0x28a   :  { %v180_v56 = vpop.xlane.xlu0 %179 }
 0x28b   :  { %2160 = vrsqrt.f32 %v183_v55  ;;  %v182_v57 = vmul.f32 0.03125, %v180_v56 }
 0x28d   :  { %v184_v58 = vadd.f32 1e-12, %v182_v57 }
 0x28f   :  { %2162 = vrsqrt.f32 %v184_v58 }
 0x295   :  { %v2161_v59 = vpop.eup %2160 }
 0x296   :  { %v187_v61 = vmul.f32 %v2161_v59, %v171_v42 }
 0x298   :  { %v193_v63 = vmul.f32 %v1743_v60, %v187_v61 }
 0x299   :  { %v2163_v0 = vpop.eup %2162 }
 0x29a   :  { %v188_v1 = vmul.f32 %v2163_v0, %v172_v41  ;;  %v2370_v2 = vadd.f32 %v1744_v62, %v193_v63 }
 0x29c   :  { %v194_v3 = vmul.f32 %v1743_v60, %v188_v1  ;;  %1897 = vmatprep.mubr.msk.f32.mxu1 %vm161_vm7, %v2370_v2 }
 0x29e   :  { %v2374_v4 = vadd.f32 %v1744_v62, %v194_v3 }
 0x2a0   :  { %1898 = vmatmul.mubr.msk.f32.vlgmr.msra.gmra.mrb[0].mxu1 %vm161_vm7, %v2374_v4 }
 0x373   :  { %v1899_v6 = vpop.f32.mrb[0].mxu1 }
 0x374   :  { %v2381_v7 = vadd.f32 %v1899_v6, %v1745_v5  ;;  %v282_v8 = vpop.f32.mrb[1].mxu1 }
 0x375   :  { %v2383_v9 = vadd.f32 %v1745_v5, %v282_v8 }
 0x377   :  { %1904 = vmatprep.mubr.msk.f32.mxu1 %vm304_vm8, %v2383_v9  ;;  %v2389_v10 = vpack.i.bf16 %v2381_v7, %v2383_v9 }
 0x379   :  { %2121 = vrot.lane.b32.xlu1 %v2389_v10, %s2234_s11 }
 0x37d   :  { %2131 = vrot.lane.b32.xlu1 %v2389_v10, %s2235_s12 }
 0x3eb   :  { %v2122_v11 = vpop.permute.xlu1 %2121 }
 0x3ec   :  { %v2124_v12 = vunpack.i.h.bf16 %v2122_v11  ;;  %v2123_v13 = vunpack.i.l.bf16 %v2122_v11 }
 0x3ee   :  { %v2030_v15 = vpack.c.bf16 %v2124_v12, %v2123_v13 }
 0x3ef   :  { %v2132_v35 = vpop.permute.xlu1 %2131 }
 0x3f0   :  { %2032 = vmatprep.subr.msk.bf16.mxu1 %vm2395_vm9, %v2030_v15  ;;  %v2134_v38 = vunpack.i.h.bf16 %v2132_v35  ;;  %v2133_v39 = vunpack.i.l.bf16 %v2132_v35 }
 0x3f1   :  { %2035 = vmatpush3.bf16.xpose.msk.msra.mxu1 %vm2395_vm9, %v2030_v15 }
 0x3f2   :  { %v2040_v42 = vpack.c.bf16 %v2134_v38, %v2133_v39 }
 0x3f8   :  { %1905 = vmatmul.mubr.msk.f32.vlgmr.msra.gmra.mrb[2].mxu1 %vm304_vm8, %v2381_v7 }
 0x4cb   :  { %v1906_v17 = vpop.f32.mrb[2].mxu1 }
 0x4cc   :  { %v385_v19 = vadd.f32 %v1906_v17, %v2408_v16  ;;  %v379_v20 = vpop.f32.mrb[3].mxu1 }
 0x4cd   :  { %v380_v21 = vadd.f32 %v379_v20, %v2413_v18 }
 0x4ce   :  { %v392_v22 = vsel %vm388_vm10, %v385_v19, -inf }
 0x4cf   :  { %393 = vmax.xlane.f32.xlu0 %v392_v22  ;;  %v389_v23 = vsel %vm388_vm10, %v380_v21, -inf }
 0x4d3   :  { %390 = vmax.xlane.f32.xlu0 %v389_v23 }
 0x4e9   :  { %2126 = vrot.lane.b32.xlu0 %v2389_v10, %s2236_s17  ;;  %s2245_s17 = smov [#allocation2]  }
 0x4ea   :  { %s1728_s2 = sshll.u32 %s2245_s17, 4  ;;  %s1729_s2 = int_to_ptr.vmem [resolvable:$true] %s1728_s2 }
 0x4eb   :  { %s2208_s18 = scalar_lea.vmem %s1729_s2, 256  ;;  %p2213_p1 = scmp.lt.s32.totalorder %s1729_s2, %s1729_s2 }
 0x4ec   :  { %p2209_p0 = scmp.ne.s32.totalorder %s1729_s2, %s2208_s18  ;;  %p2214_p2 = scmp.lt.s32.totalorder %s2208_s18, %s2208_s18 }
 0x4ee   :  { %p2215_p3 = por %p2214_p2, %p2213_p1 }
 0x4f0   :  { %p2216_p4 = pnand %p2215_p3, %p2209_p0 }
 0x55c   :  { %v394_v24 = vpop.xlane.xlu0 %393 }
 0x55d   :  { %v396_v25 = vsub.f32 %v385_v19, %v394_v24 }
 0x55f   :  { %v399_v26 = vmul.f32 1.442695, %v396_v25 }
 0x560   :  { %v391_v27 = vpop.xlane.xlu0 %390 }
 0x561   :  { %2164 = vpow2.f32 %v399_v26  ;;  %v395_v28 = vsub.f32 %v380_v21, %v391_v27 }
 0x563   :  { %v397_v29 = vmul.f32 1.442695, %v395_v28 }
 0x564   :  { %v2127_v30 = vpop.permute.xlu0 %2126 }
 0x565   :  { %2166 = vpow2.f32 %v397_v29  ;;  %v2129_v31 = vunpack.i.h.bf16 %v2127_v30  ;;  %v2128_v32 = vunpack.i.l.bf16 %v2127_v30 }
 0x567   :  { %v2036_v33 = vpack.c.bf16 %v2129_v31, %v2128_v32 }
 0x569   :  { %2037 = vmatprep.subr.bf16.mxu1 %v2036_v33 }
 0x56a   :  { %2039 = vmatpush3.bf16.msra.mxu1 %v2036_v33 }
 0x56b   :  { %v2165_v36 = vpop.eup %2164  ;;  %1914 = vmatprep.subr.mxu1 %v498_v34 }
 0x56c   :  { %v404_v37 = vsel %vm388_vm10, %v2165_v36, 0.0 }
 0x56d   :  { %405 = vadd.xlane.f32.xlu0 %v404_v37 }
 0x56f   :  { %v2167_v40 = vpop.eup %2166 }
 0x570   :  { %1911 = vmatprep.mubr.msk.f32.mxu1 %vm388_vm10, %v2167_v40  ;;  %v401_v41 = vsel %vm388_vm10, %v2167_v40, 0.0 }
 0x571   :  { %402 = vadd.xlane.f32.xlu1 %v401_v41  ;;  %1912 = vmatmul.mubr.msk.f32.vlgmr.msra.gmra.mrb[4].mxu1 %vm388_vm10, %v2165_v36 }
 0x572   :  { %1915 = vmatpush3.msra.mxu1 %v498_v34  ;;  %v782_v34 = vld [vmem:[%s2593_s7 + $0x8] sm:$0xff] }
 0x573   :  { %2042 = vmatprep.subr.msk.bf16.mxu1 %vm2395_vm9, %v2040_v42 }
 0x582   :  { %584 = vrot.lane.b32.xlu1 %v2381_v7, %s2237_s19 }
 0x583   :  { %582 = vrot.lane.b32.xlu0 %v2383_v9, %s2237_s19 }
 0x586   :  { %2136 = vrot.lane.b32.xlu1 %v2389_v10, %s2238_s20 }
 0x58a   :  { %866 = vrot.lane.b32.xlu1 %v2383_v9, %s2239_s3 }
 0x58e   :  { %868 = vrot.lane.b32.xlu1 %v2381_v7, %s2239_s3 }
 0x5fa   :  { %v406_v44 = vpop.xlane.xlu0 %405 }
 0x5fe   :  { %v403_v43 = vpop.xlane.xlu1 %402  ;;  %v583_v55 = vpop.permute.xlu0 %582 }
 0x5ff   :  { %2168 = vrcp.f32 %v403_v43 }
 0x600   :  { %2170 = vrcp.f32 %v406_v44 }
 0x602   :  { %v585_v45 = vpop.permute.xlu1 %584 }
 0x606   :  { %v2137_v46 = vpop.permute.xlu1 %2136 }
 0x607   :  { %v2139_v49 = vunpack.i.h.bf16 %v2137_v46  ;;  %v2138_v50 = vunpack.i.l.bf16 %v2137_v46 }
 0x609   :  { %v2169_v48 = vpop.eup %2168  ;;  %v2050_v56 = vpack.c.bf16 %v2139_v49, %v2138_v50 }
 0x60a   :  { %v2171_v52 = vpop.eup %2170  ;;  %v867_v57 = vpop.permute.xlu1 %866 }
 0x60e   :  { %v869_v58 = vpop.permute.xlu1 %868 }
 0x644   :  { %v1913_v47 = vpop.f32.mrb[4].mxu1 }
 0x645   :  { %v487_v51 = vpop.f32.mrb[5].mxu1  ;;  %v497_v54 = vmul.f32 %v2171_v52, %v1913_v47 }
 0x646   :  { %v496_v53 = vmul.f32 %v2169_v48, %v487_v51 }
 0x648   :  { %1916 = vmatprep.mubr.msk.f32.mxu1 %vm304_vm8, %v496_v53 }
 0x649   :  { %1917 = vmatmul.mubr.msk.f32.vlgmr.msra.gmra.mrb[6].mxu1 %vm304_vm8, %v497_v54 }
 0x64a   :  { %2045 = vmatpush3.bf16.xpose.msk.msra.mxu1 %vm2395_vm9, %v2040_v42  ;;  %1923 = vmatprep.mubr.msk.f32.mxu1 %vm304_vm8, %v583_v55 }
 0x64b   :  { %2052 = vmatprep.subr.msk.bf16.mxu1 %vm2395_vm9, %v2050_v56 }
 0x651   :  { %1924 = vmatmul.mubr.msk.f32.vlgmr.msra.gmra.mrb[8].mxu1 %vm304_vm8, %v585_v45 }
 0x652   :  { %2055 = vmatpush3.bf16.xpose.msk.msra.mxu1 %vm2395_vm9, %v2050_v56  ;;  %1942 = vmatprep.mubr.msk.f32.mxu1 %vm304_vm8, %v867_v57 }
 0x659   :  { %1943 = vmatmul.mubr.msk.f32.vlgmr.msra.gmra.mrb[10].mxu1 %vm304_vm8, %v869_v58  ;;  %v1066_v58 = vld [vmem:[%s2593_s7 + $0x10] sm:$0xff] }
 0x71c   :  { %v2446_v59 = vpop.f32.mrb[6].mxu1 }
 0x71d   :  { %v2448_v60 = vpop.f32.mrb[7].mxu1 }
 0x724   :  { %v1925_v61 = vpop.f32.mrb[8].mxu1 }
 0x725   :  { %v670_v62 = vadd.f32 %v1925_v61, %v2408_v16  ;;  %v664_v63 = vpop.f32.mrb[9].mxu1 }
 0x726   :  { %v665_v0 = vadd.f32 %v664_v63, %v2413_v18 }
 0x727   :  { %v676_v1 = vsel %vm388_vm10, %v670_v62, -inf }
 0x728   :  { %677 = vmax.xlane.f32.xlu1 %v676_v1  ;;  %v673_v3 = vsel %vm388_vm10, %v665_v0, -inf }
 0x729   :  { %674 = vmax.xlane.f32.xlu0 %v673_v3 }
 0x72c   :  { %v1944_v5 = vpop.f32.mrb[10].mxu1 }
 0x72d   :  { %v948_v6 = vpop.f32.mrb[11].mxu1  ;;  %v954_v31 = vadd.f32 %v1944_v5, %v2408_v16 }
 0x72e   :  { %v949_v8 = vadd.f32 %v948_v6, %v2413_v18 }
 0x72f   :  { %v960_v14 = vsel %vm388_vm10, %v954_v31, -inf }
 0x730   :  { %v957_v11 = vsel %vm388_vm10, %v949_v8, -inf }
 0x739   :  { %2146 = vrot.lane.b32.xlu1 %v2389_v10, %s2240_s21 }
 0x73d   :  { %1152 = vrot.lane.b32.xlu1 %v2381_v7, %s2241_s22 }
 0x73f   :  { %2141 = vrot.lane.b32.xlu0 %v2389_v10, %s2242_s23 }
 0x743   :  { %1150 = vrot.lane.b32.xlu0 %v2383_v9, %s2241_s22 }
 0x762   :  { %958 = vmax.xlane.f32.xlu0 %v957_v11 }
 0x7b5   :  { %v678_v12 = vpop.xlane.xlu1 %677 }
 0x7b6   :  { %v680_v13 = vsub.f32 %v670_v62, %v678_v12  ;;  %v675_v15 = vpop.xlane.xlu0 %674 }
 0x7b7   :  { %v679_v17 = vsub.f32 %v665_v0, %v675_v15 }
 0x7b8   :  { %v683_v19 = vmul.f32 1.442695, %v680_v13 }
 0x7b9   :  { %v681_v20 = vmul.f32 1.442695, %v679_v17  ;;  %v2147_v21 = vpop.permute.xlu1 %2146 }
 0x7ba   :  { %2172 = vpow2.f32 %v683_v19  ;;  %v2149_v22 = vunpack.i.h.bf16 %v2147_v21  ;;  %v2148_v7 = vunpack.i.l.bf16 %v2147_v21  ;;  %v2142_v23 = vpop.permute.xlu0 %2141 }
 0x7bb   :  { %2174 = vpow2.f32 %v681_v20  ;;  %v2144_v24 = vunpack.i.h.bf16 %v2142_v23  ;;  %v2143_v25 = vunpack.i.l.bf16 %v2142_v23 }
 0x7bc   :  { %v2060_v9 = vpack.c.bf16 %v2149_v22, %v2148_v7 }
 0x7bd   :  { %v2046_v26 = vpack.c.bf16 %v2144_v24, %v2143_v25  ;;  %v1153_v32 = vpop.permute.xlu1 %1152 }
 0x7be   :  { %2062 = vmatprep.subr.msk.bf16.mxu1 %vm2395_vm9, %v2060_v9  ;;  %v1151_v27 = vpop.permute.xlu0 %1150 }
 0x7bf   :  { %2047 = vmatprep.subr.bf16.mxu0 %v2046_v26  ;;  %2065 = vmatpush3.bf16.xpose.msk.msra.mxu1 %vm2395_vm9, %v2060_v9 }
 0x7c0   :  { %1961 = vmatprep.mubr.msk.f32.mxu1 %vm304_vm8, %v1151_v27  ;;  %2049 = vmatpush3.bf16.msra.mxu0 %v2046_v26  ;;  %v1350_v27 = vld [vmem:[%s2593_s7 + $0x18] sm:$0xff] }
 0x7c1   :  { %1933 = vmatprep.subr.mxu0 %v782_v34 }
 0x7c4   :  { %v2173_v28 = vpop.eup %2172 }
 0x7c5   :  { %v2175_v29 = vpop.eup %2174  ;;  %v688_v30 = vsel %vm388_vm10, %v2173_v28, 0.0 }
 0x7c6   :  { %689 = vadd.xlane.f32.xlu1 %v688_v30  ;;  %1930 = vmatprep.mubr.msk.f32.mxu0 %vm388_vm10, %v2175_v29  ;;  %v685_v33 = vsel %vm388_vm10, %v2175_v29, 0.0 }
 0x7c7   :  { %1962 = vmatmul.mubr.msk.f32.vlgmr.msra.gmra.mrb[12].mxu1 %vm304_vm8, %v1153_v32  ;;  %686 = vadd.xlane.f32.xlu0 %v685_v33 }
 0x7c8   :  { %1931 = vmatmul.mubr.msk.f32.vlgmr.msra.gmra.mrb[2].mxu0 %vm388_vm10, %v2173_v28 }
 0x7c9   :  { %1934 = vmatpush3.msra.mxu0 %v782_v34 }
 0x7cb   :  { %961 = vmax.xlane.f32.xlu0 %v960_v14 }
 0x7d7   :  { %2151 = vrot.lane.b32.xlu1 %v2389_v10, %s2243_s24 }
 0x7db   :  { %2156 = vrot.lane.b32.xlu1 %v2389_v10, %s2244_s26 }
 0x7ef   :  { %v959_v40 = vpop.xlane.xlu0 %958 }
 0x7f0   :  { %v963_v44 = vsub.f32 %v949_v8, %v959_v40 }
 0x7f2   :  { %v965_v46 = vmul.f32 1.442695, %v963_v44 }
 0x853   :  { %v690_v35 = vpop.xlane.xlu1 %689 }
 0x854   :  { %v687_v41 = vpop.xlane.xlu0 %686 }
 0x855   :  { %2176 = vrcp.f32 %v687_v41 }
 0x856   :  { %2178 = vrcp.f32 %v690_v35  ;;  %v1748_v35 = vld [vmem:[%s2591_s5 + $0x1] ss:$0 sm:$0xff] }
 0x857   :  { %v2152_v36 = vpop.permute.xlu1 %2151 }
 0x858   :  { %v2154_v37 = vunpack.i.h.bf16 %v2152_v36  ;;  %v2153_v38 = vunpack.i.l.bf16 %v2152_v36  ;;  %v962_v42 = vpop.xlane.xlu0 %961  ;;  %v581_v36 = vadd.f32 %v2446_v59, %v1748_v35 }
 0x859   :  { %v964_v43 = vsub.f32 %v954_v31, %v962_v42 }
 0x85a   :  { %v2056_v39 = vpack.c.bf16 %v2154_v37, %v2153_v38  ;;  %v580_v37 = vadd.f32 %v1748_v35, %v2448_v60 }
 0x85b   :  { %v967_v45 = vmul.f32 1.442695, %v964_v43  ;;  %v2157_v53 = vpop.permute.xlu1 %2156 }
 0x85c   :  { %2057 = vmatprep.subr.bf16.mxu0 %v2056_v39  ;;  %v2159_v62 = vunpack.i.h.bf16 %v2157_v53  ;;  %v2158_v63 = vunpack.i.l.bf16 %v2157_v53 }
 0x85d   :  { %2180 = vpow2.f32 %v967_v45 }
 0x85e   :  { %2182 = vpow2.f32 %v965_v46  ;;  %v2066_v0 = vpack.c.bf16 %v2159_v62, %v2158_v63 }
 0x85f   :  { %v2177_v49 = vpop.eup %2176 }
 0x860   :  { %v2179_v52 = vpop.eup %2178 }
 0x867   :  { %v2181_v57 = vpop.eup %2180 }
 0x868   :  { %v2183_v61 = vpop.eup %2182 }
 0x869   :  { %v969_v3 = vsel %vm388_vm10, %v2183_v61, 0.0 }
 0x89a   :  { %v1963_v10 = vpop.f32.mrb[12].mxu1 }
 0x89b   :  { %v1932_v47 = vpop.f32.mrb[2].mxu0  ;;  %v1232_v48 = vpop.f32.mrb[13].mxu1  ;;  %v1238_v1 = vadd.f32 %v1963_v10, %v2408_v16 }
 0x89c   :  { %v1233_v50 = vadd.f32 %v1232_v48, %v2413_v18  ;;  %v771_v51 = vpop.f32.mrb[3].mxu0  ;;  %v781_v55 = vmul.f32 %v2179_v52, %v1932_v47  ;;  %v972_v18 = vsel %vm388_vm10, %v2181_v57, 0.0  ;;  %v1477_v52 = vld [vmem:[%s2594_s8 + $0x8] sm:$0xff] }
 0x89d   :  { %v780_v54 = vmul.f32 %v2177_v49, %v771_v51  ;;  %v1244_v5 = vsel %vm388_vm10, %v1238_v1, -inf }
 0x89e   :  { %v1241_v56 = vsel %vm388_vm10, %v1233_v50, -inf }
 0x89f   :  { %1242 = vmax.xlane.f32.xlu0 %v1241_v56  ;;  %1935 = vmatprep.mubr.msk.f32.mxu0 %vm304_vm8, %v780_v54  ;;  %v1478_v54 = vld [vmem:[%s2594_s8 + $0x10] sm:$0xff] }
 0x8a0   :  { %1936 = vmatmul.mubr.msk.f32.vlgmr.msra.gmra.mrb[4].mxu0 %vm304_vm8, %v781_v55  ;;  %v1479_v55 = vld [vmem:[%s2594_s8 + $0x18] sm:$0xff] }
 0x8a1   :  { %2059 = vmatpush3.bf16.msra.mxu0 %v2056_v39  ;;  %1949 = vmatprep.mubr.msk.f32.mxu0 %vm388_vm10, %v2183_v61  ;;  %v2074_v56 = vpack.c.bf16 %v1479_v55, %v1478_v54 }
 0x8a2   :  { %1952 = vmatprep.subr.mxu0 %v1066_v58 }
 0x8a3   :  { %973 = vadd.xlane.f32.xlu0 %v972_v18 }
 0x8a4   :  { %1950 = vmatmul.mubr.msk.f32.vlgmr.msra.gmra.mrb[6].mxu0 %vm388_vm10, %v2181_v57 }
 0x8a5   :  { %1953 = vmatpush3.msra.mxu0 %v1066_v58 }
 0x8a6   :  { %2067 = vmatprep.subr.bf16.mxu0 %v2066_v0 }
 0x8a7   :  { %970 = vadd.xlane.f32.xlu0 %v969_v3 }
 0x8ab   :  { %1245 = vmax.xlane.f32.xlu0 %v1244_v5  ;;  %v1782_v5 = vld [vmem:[%s2590_s4 + $0x3] ss:$0 sm:$0xff] }
 0x92c   :  { %v1243_v6 = vpop.xlane.xlu0 %1242 }
 0x92d   :  { %v1247_v8 = vsub.f32 %v1233_v50, %v1243_v6 }
 0x92f   :  { %v1249_v11 = vmul.f32 1.442695, %v1247_v8 }
 0x930   :  { %v974_v12 = vpop.xlane.xlu0 %973 }
 0x931   :  { %2184 = vpow2.f32 %v1249_v11 }
 0x934   :  { %v971_v13 = vpop.xlane.xlu0 %970 }
 0x938   :  { %v1246_v15 = vpop.xlane.xlu0 %1245 }
 0x939   :  { %v1248_v17 = vsub.f32 %v1238_v1, %v1246_v15  ;;  %v1781_v1 = vld [vmem:[%s2590_s4 + $0x2] ss:$0 sm:$0xff] }
 0x93b   :  { %v2185_v19 = vpop.eup %2184  ;;  %v1251_v20 = vmul.f32 1.442695, %v1248_v17  ;;  %v1584_v17 = vld [vmem:[%s2595_s9] sm:$0xff] }
 0x93c   :  { %v1253_v21 = vsel %vm388_vm10, %v2185_v19, 0.0 }
 0x93d   :  { %2186 = vpow2.f32 %v1251_v20  ;;  %1254 = vadd.xlane.f32.xlu0 %v1253_v21  ;;  %v1586_v21 = vld [vmem:[%s2595_s9 + $0x10] sm:$0xff] }
 0x93e   :  { %2188 = vrcp.f32 %v971_v13 }
 0x93f   :  { %2190 = vrcp.f32 %v974_v12 }
 0x947   :  { %v2187_v16 = vpop.eup %2186 }
 0x948   :  { %v1256_v22 = vsel %vm388_vm10, %v2187_v16, 0.0  ;;  %v2189_v23 = vpop.eup %2188 }
 0x949   :  { %1257 = vadd.xlane.f32.xlu1 %v1256_v22  ;;  %v2191_v25 = vpop.eup %2190 }
 0x977   :  { %v1951_v7 = vpop.f32.mrb[6].mxu0 }
 0x978   :  { %v1055_v24 = vpop.f32.mrb[7].mxu0  ;;  %v1065_v26 = vmul.f32 %v2191_v25, %v1951_v7  ;;  %v1588_v7 = vld [vmem:[%s2595_s9 + $0x20] sm:$0xff]  ;;  %v1590_v25 = vld [vmem:[%s2595_s9 + $0x30] sm:$0xff] }
 0x979   :  { %v1064_v9 = vmul.f32 %v2189_v23, %v1055_v24  ;;  %v1589_v23 = vld [vmem:[%s2595_s9 + $0x28] sm:$0xff] }
 0x97a   :  { %v2086_v24 = vpack.c.bf16 %v1589_v23, %v1588_v7 }
 0x97b   :  { %1954 = vmatprep.mubr.msk.f32.mxu0 %vm304_vm8, %v1064_v9  ;;  %v1591_v9 = vld [vmem:[%s2595_s9 + $0x38] sm:$0xff] }
 0x97c   :  { %1955 = vmatmul.mubr.msk.f32.vlgmr.msra.gmra.mrb[4].mxu0 %vm304_vm8, %v1065_v26  ;;  %v2090_v26 = vpack.c.bf16 %v1591_v9, %v1590_v25 }
 0x97d   :  { %2069 = vmatpush3.bf16.msra.mxu0 %v2066_v0  ;;  %1968 = vmatprep.mubr.msk.f32.mxu0 %vm388_vm10, %v2185_v19  ;;  %v1585_v19 = vld [vmem:[%s2595_s9 + $0x8] sm:$0xff] }
 0x97e   :  { %1971 = vmatprep.subr.mxu0 %v1350_v27  ;;  %v2078_v20 = vpack.c.bf16 %v1585_v19, %v1584_v17 }
 0x980   :  { %1969 = vmatmul.mubr.msk.f32.vlgmr.msra.gmra.mrb[8].mxu0 %vm388_vm10, %v2187_v16  ;;  %v1587_v16 = vld [vmem:[%s2595_s9 + $0x18] sm:$0xff] }
 0x981   :  { %1972 = vmatpush3.msra.mxu0 %v1350_v27  ;;  %v2082_v22 = vpack.c.bf16 %v1587_v16, %v1586_v21  ;;  %v1783_v27 = vld [vmem:[%s2591_s5 + $0x2] ss:$0 sm:$0xff] }
 0x982   :  { %2079 = vmatprep.subr.bf16.mxu0 %v2078_v20 }
 0x9ca   :  { %v1255_v28 = vpop.xlane.xlu0 %1254 }
 0x9cb   :  { %2192 = vrcp.f32 %v1255_v28 }
 0x9d5   :  { %v2193_v31 = vpop.eup %2192 }
 0x9d6   :  { %v1258_v29 = vpop.xlane.xlu1 %1257 }
 0x9d7   :  { %2194 = vrcp.f32 %v1258_v29 }
 0x9e1   :  { %v2195_v33 = vpop.eup %2194 }
 0xa53   :  { %v1970_v30 = vpop.f32.mrb[8].mxu0 }
 0xa54   :  { %v1339_v32 = vpop.f32.mrb[9].mxu0  ;;  %v1349_v34 = vmul.f32 %v2195_v33, %v1970_v30 }
 0xa55   :  { %v1348_v14 = vmul.f32 %v2193_v31, %v1339_v32 }
 0xa57   :  { %1973 = vmatprep.mubr.msk.f32.mxu0 %vm304_vm8, %v1348_v14 }
 0xa58   :  { %1974 = vmatmul.mubr.msk.f32.vlgmr.msra.gmra.mrb[4].mxu0 %vm304_vm8, %v1349_v34 }
 0xa59   :  { %2081 = vmatpush3.bf16.msra.mxu0 %v2078_v20 }
 0xa5a   :  { %2083 = vmatprep.subr.bf16.mxu0 %v2082_v22 }
 0xa5d   :  { %2085 = vmatpush3.bf16.msra.mxu0 %v2082_v22 }
 0xa5e   :  { %2087 = vmatprep.subr.bf16.mxu0 %v2086_v24 }
 0xa61   :  { %2089 = vmatpush3.bf16.msra.mxu0 %v2086_v24 }
 0xa62   :  { %2091 = vmatprep.subr.bf16.mxu0 %v2090_v26 }
 0xa65   :  { %2093 = vmatpush3.bf16.msra.mxu0 %v2090_v26 }
 0xb2b   :  { %v1975_v38 = vpop.f32.mrb[4].mxu0 }
 0xb2c   :  { %v2095_v39 = vadd.f32 %v1975_v38, %v581_v36  ;;  %v1423_v40 = vpop.f32.mrb[5].mxu0 }
 0xb2d   :  { %v2097_v41 = vadd.f32 %v1423_v40, %v580_v37 }
 0xb2e   :  { %v1435_v44 = vadd.f32 %v2095_v39, %v2374_v4  ;;  %v1476_v4 = vld [vmem:[%s2594_s8] sm:$0xff] }
 0xb2f   :  { %v1434_v42 = vadd.f32 %v2097_v41, %v2370_v2  ;;  %v2070_v53 = vpack.c.bf16 %v1477_v52, %v1476_v4 }
 0xb30   :  { %v1441_v45 = vsel %vm161_vm7, %v1435_v44, 0.0 }
 0xb31   :  { %v1438_v43 = vsel %vm161_vm7, %v1434_v42, 0.0  ;;  %2071 = vmatprep.subr.bf16.mxu1 %v2070_v53 }
 0xb32   :  { %1439 = vadd.xlane.f32.xlu0 %v1438_v43  ;;  %2073 = vmatpush3.bf16.msra.mxu1 %v2070_v53 }
 0xb33   :  { %2075 = vmatprep.subr.bf16.mxu1 %v2074_v56 }
 0xb36   :  { %1442 = vadd.xlane.f32.xlu0 %v1441_v45  ;;  %2077 = vmatpush3.bf16.msra.mxu1 %v2074_v56 }
 0xbbf   :  { %v1440_v46 = vpop.xlane.xlu0 %1439 }
 0xbc0   :  { %v1444_v10 = vmul.f32 0.03125, %v1440_v46 }
 0xbc2   :  { %v1446_v47 = vsub.f32 %v1434_v42, %v1444_v10 }
 0xbc3   :  { %v1443_v59 = vpop.xlane.xlu0 %1442 }
 0xbc4   :  { %v1445_v48 = vmul.f32 0.03125, %v1443_v59  ;;  %v1448_v60 = vmul.f32 %v1446_v47, %v1446_v47  ;;  %v1786_v59 = vld [vmem:[%s2591_s5 + $0x3] ss:$0 sm:$0xff] }
 0xbc6   :  { %v1447_v49 = vsub.f32 %v1435_v44, %v1445_v48  ;;  %v1450_v50 = vsel %vm161_vm7, %v1448_v60, 0.0 }
 0xbc7   :  { %1451 = vadd.xlane.f32.xlu0 %v1450_v50 }
 0xbc8   :  { %v1449_v51 = vmul.f32 %v1447_v49, %v1447_v49 }
 0xbca   :  { %v1453_v2 = vsel %vm161_vm7, %v1449_v51, 0.0 }
 0xbcb   :  { %1454 = vadd.xlane.f32.xlu0 %v1453_v2 }
 0xc54   :  { %v1452_v57 = vpop.xlane.xlu0 %1451 }
 0xc55   :  { %v1456_v58 = vmul.f32 0.03125, %v1452_v57 }
 0xc57   :  { %v1458_v61 = vadd.f32 1e-12, %v1456_v58 }
 0xc58   :  { %v1455_v62 = vpop.xlane.xlu0 %1454 }
 0xc59   :  { %2196 = vrsqrt.f32 %v1458_v61  ;;  %v1457_v63 = vmul.f32 0.03125, %v1455_v62 }
 0xc5b   :  { %v1459_v18 = vadd.f32 1e-12, %v1457_v63 }
 0xc5d   :  { %2198 = vrsqrt.f32 %v1459_v18 }
 0xc63   :  { %v2197_v0 = vpop.eup %2196 }
 0xc64   :  { %v1462_v3 = vmul.f32 %v2197_v0, %v1446_v47 }
 0xc66   :  { %v1468_v6 = vmul.f32 %v1781_v1, %v1462_v3 }
 0xc67   :  { %v2199_v8 = vpop.eup %2198 }
 0xc68   :  { %v1463_v11 = vmul.f32 %v2199_v8, %v1447_v49  ;;  %v1474_v12 = vadd.f32 %v1782_v5, %v1468_v6 }
 0xc6a   :  { %v1469_v13 = vmul.f32 %v1781_v1, %v1463_v11  ;;  %1984 = vmatprep.mubr.msk.f32.mxu1 %vm161_vm7, %v1474_v12 }
 0xc6c   :  { %v1475_v15 = vadd.f32 %v1782_v5, %v1469_v13 }
 0xc6e   :  { %1985 = vmatmul.mubr.msk.f32.vlgmr.msra.gmra.mrb[14].mxu1 %vm161_vm7, %v1475_v15 }
 0xd41   :  { %v1986_v28 = vpop.f32.mrb[14].mxu1 }
 0xd42   :  { %v1563_v29 = vadd.f32 %v1986_v28, %v1783_v27  ;;  %v1557_v30 = vpop.f32.mrb[15].mxu1 }
 0xd43   :  { %v1558_v31 = vadd.f32 %v1783_v27, %v1557_v30 }
 0xd44   :  { %v1569_v32 = vmul.f32 0.044715, %v1563_v29  ;;  %v1567_v46 = vmul.f32 0.5, %v1563_v29 }
 0xd45   :  { %v1568_v33 = vmul.f32 0.044715, %v1558_v31  ;;  %v1566_v44 = vmul.f32 0.5, %v1558_v31 }
 0xd46   :  { %v1571_v14 = vmul.f32 %v1569_v32, %v1563_v29 }
 0xd47   :  { %v1570_v34 = vmul.f32 %v1568_v33, %v1558_v31 }
 0xd48   :  { %v1573_v35 = vmul.f32 %v1571_v14, %v1563_v29 }
 0xd49   :  { %v1572_v36 = vmul.f32 %v1570_v34, %v1558_v31 }
 0xd4a   :  { %v1575_v37 = vadd.f32 %v1573_v35, %v1563_v29 }
 0xd4b   :  { %v1574_v38 = vadd.f32 %v1572_v36, %v1558_v31 }
 0xd4c   :  { %v1577_v39 = vmul.f32 0.7978846, %v1575_v37 }
 0xd4d   :  { %v1576_v40 = vmul.f32 0.7978846, %v1574_v38 }
 0xd4e   :  { %2200 = vtanh.f32 %v1577_v39 }
 0xd4f   :  { %2202 = vtanh.f32 %v1576_v40 }
 0xd58   :  { %v2201_v41 = vpop.eup %2200 }
 0xd59   :  { %v2203_v42 = vpop.eup %2202  ;;  %v1581_v43 = vadd.f32 1.0, %v2201_v41 }
 0xd5a   :  { %v1580_v45 = vadd.f32 1.0, %v2203_v42 }
 0xd5b   :  { %v1583_v47 = vmul.f32 %v1581_v43, %v1567_v46 }
 0xd5c   :  { %v1582_v10 = vmul.f32 %v1580_v45, %v1566_v44 }
 0xd5e   :  { %2003 = vmatprep.mubr.msk.f32.mxu0 %vm1597_vm11, %v1582_v10 }
 0xd5f   :  { %2004 = vmatmul.mubr.msk.f32.vlgmr.msra.gmra.mrb[10].mxu0 %vm1597_vm11, %v1583_v47 }
 0xe32   :  { %v2005_v48 = vpop.f32.mrb[10].mxu0 }
 0xe33   :  { %v1670_v60 = vpop.f32.mrb[11].mxu0  ;;  %v1676_v49 = vadd.f32 %v2005_v48, %v1786_v59 }
 0xe34   :  { %v1671_v50 = vadd.f32 %v1786_v59, %v1670_v60 }
 0xe35   :  { %v1680_v4 = vadd.f32 %v1676_v49, %v1475_v15  ;;  %v1790_v15 = vld [vmem:[%s2590_s4 + $0x5] ss:$0 sm:$0xff] }
 0xe36   :  { %v1679_v51 = vadd.f32 %v1671_v50, %v1474_v12  ;;  %v1789_v12 = vld [vmem:[%s2590_s4 + $0x4] ss:$0 sm:$0xff] }
 0xe37   :  { %v1686_v52 = vsel %vm161_vm7, %v1680_v4, 0.0 }
 0xe38   :  { %v1683_v2 = vsel %vm161_vm7, %v1679_v51, 0.0 }
 0xe39   :  { %1684 = vadd.xlane.f32.xlu0 %v1683_v2 }
 0xe3d   :  { %1687 = vadd.xlane.f32.xlu0 %v1686_v52 }
 0xec6   :  { %v1685_v53 = vpop.xlane.xlu0 %1684 }
 0xec7   :  { %v1689_v54 = vmul.f32 0.03125, %v1685_v53 }
 0xec9   :  { %v1691_v55 = vsub.f32 %v1679_v51, %v1689_v54 }
 0xeca   :  { %v1688_v56 = vpop.xlane.xlu0 %1687 }
 0xecb   :  { %v1690_v57 = vmul.f32 0.03125, %v1688_v56  ;;  %v1693_v58 = vmul.f32 %v1691_v55, %v1691_v55 }
 0xecd   :  { %v1692_v61 = vsub.f32 %v1680_v4, %v1690_v57  ;;  %v1695_v62 = vsel %vm161_vm7, %v1693_v58, 0.0 }
 0xece   :  { %1696 = vadd.xlane.f32.xlu0 %v1695_v62 }
 0xecf   :  { %v1694_v63 = vmul.f32 %v1692_v61, %v1692_v61 }
 0xed1   :  { %v1698_v18 = vsel %vm161_vm7, %v1694_v63, 0.0 }
 0xed2   :  { %1699 = vadd.xlane.f32.xlu0 %v1698_v18 }
 0xf5b   :  { %v1697_v0 = vpop.xlane.xlu0 %1696 }
 0xf5c   :  { %v1701_v1 = vmul.f32 0.03125, %v1697_v0 }
 0xf5e   :  { %v1703_v3 = vadd.f32 1e-12, %v1701_v1 }
 0xf5f   :  { %v1700_v5 = vpop.xlane.xlu0 %1699 }
 0xf60   :  { %2204 = vrsqrt.f32 %v1703_v3  ;;  %v1702_v6 = vmul.f32 0.03125, %v1700_v5 }
 0xf62   :  { %v1704_v8 = vadd.f32 1e-12, %v1702_v6 }
 0xf64   :  { %2206 = vrsqrt.f32 %v1704_v8 }
 0xf6a   :  { %v2205_v11 = vpop.eup %2204 }
 0xf6b   :  { %v1707_v13 = vmul.f32 %v2205_v11, %v1691_v55 }
 0xf6d   :  { %v1713_v17 = vmul.f32 %v1789_v12, %v1707_v13 }
 0xf6e   :  { %v2207_v19 = vpop.eup %2206 }
 0xf6f   :  { %v1708_v20 = vmul.f32 %v2207_v19, %v1692_v61  ;;  %v1719_v21 = vadd.f32 %v1790_v15, %v1713_v17 }
 0xf71   :  { %v1714_v16 = vmul.f32 %v1789_v12, %v1708_v20  ;;  %1721 = vst.msk [vmem:[#allocation2] sm:$0xff] %vm161_vm7, %v1719_v21 }
 0xf73   :  { %v1720_v22 = vadd.f32 %v1790_v15, %v1714_v16 }
 0xf75   :  { %1722 = vst.msk [vmem:[#allocation2 + $0x8] sm:$0xff] %vm161_vm7, %v1720_v22 }
 0xf76   :  { %2219 = shalt.err (!%p2216_p4)
}
 0xf77   :  { %s2220_s20 = scalar_lea.hbm %s2596_s10, 256 }
 0xf78   :  { %p2221_p5 = scmp.ne.s32.totalorder %s2596_s10, %s2220_s20  ;;  %p2224_p6 = scmp.lt.u32.totalorder %s2220_s20, %s2596_s10 }
 0xf7a   :  { %p2226_p7 = pnand %p2224_p6, %p2221_p5 }
 0xf7c   :  { %2229 = shalt.err (!%p2226_p7)
}
 0xf7d   :  { %s2246_s23 = smov 128   ;;  %s2247_s24 = smov 8  }
 0xf7e   :  { %1734 = dma.vmem_to_hbm [thread:$0]  %s1729_s2, 256, %s2596_s10, [#allocation3], %s2246_s23, %s2246_s23, %s2247_s24  }
 0xf7f   :  { %2230 = dma.done.wait [#allocation3], 256  }
 0xf80   :  { %2231 = vsyncadd [#allocation3], 4294967040 }
 0xf81   :  { %1738 = vsyncpa [#allocation3], 1 }

</bundles_post_ra>
